<compile_context>
chip_gen: v6e
topology: v6e:2x2x1
jax: 0.10.0
libtpu: 0.0.40
codegen_flags: <defaults>
</compile_context>

<pallas_src>
import jax
import jax.numpy as jnp
from jax.experimental import pallas as pl
from jax.experimental.pallas import tpu as pltpu

KSIZE = 7          # conv kernel size
PAD = KSIZE // 2   # padding = 3


def _device_budget():
    """(num_tensorcores, safe scoped-VMEM cap in bytes) for the local TPU."""
    num_cores, vmem_cap = 1, 48 << 20            # conservative default
    try:
        kind = jax.devices()[0].device_kind.lower()
        if "v7" in kind:
            num_cores, vmem_cap = 2, 52 << 20    # 2 TCs, 64 MiB VMEM per TC
        else:
            num_cores, vmem_cap = 1, 96 << 20    # v4/v5e/v6e: 1 TC, 128 MiB VMEM
    except Exception:
        pass
    return num_cores, vmem_cap


def _folded_conv_operator(weight, H, W, C, HW_pad):
    """Fold Conv2d(2, 1, 7, padding=3) into one stacked (2*HWp, HWp) bf16 matrix.

    Rows [0, HW)          : MaxPool-channel taps.
    Rows [HW_pad, HW_pad+HW): AvgPool-channel taps, pre-scaled by 1/C so the
    kernel can feed a channel *sum* instead of a mean. Padded rows/cols are 0.
    """
    HW = H * W
    if HW > 2048:
        # TODO(synk): replace the dense (HW, HW) folding with a 49-tap pltpu.roll
        # weighted-add formulation for large feature maps (dense operator blows VMEM).
        raise NotImplementedError("dense folded 7x7 conv supports H*W <= 2048 only")

    w = jnp.asarray(weight, jnp.float32)[0]                  # (2, 7, 7)
    pi = jnp.arange(H)[:, None, None, None]
    pj = jnp.arange(W)[None, :, None, None]
    qi = jnp.arange(H)[None, None, :, None]
    qj = jnp.arange(W)[None, None, None, :]
    dy = pi - qi + PAD                                       # (H, 1, H, 1)
    dx = pj - qj + PAD                                       # (1, W, 1, W)
    valid = (dy >= 0) & (dy < KSIZE) & (dx >= 0) & (dx < KSIZE)
    dyc = jnp.clip(dy, 0, KSIZE - 1)
    dxc = jnp.clip(dx, 0, KSIZE - 1)

    def build(wc):
        vals = wc[dyc, dxc]                                  # (H, W, H, W)
        mat = jnp.where(valid, vals, 0.0).reshape(HW, HW)
        if HW_pad != HW:
            mat = jnp.pad(mat, ((0, HW_pad - HW), (0, HW_pad - HW)))
        return mat

    a_max = build(w[0])
    a_avg = build(w[1]) / float(C)                           # fold the 1/C of the mean
    return jnp.concatenate([a_max, a_avg], axis=0).astype(jnp.bfloat16)


def spatial_attention_kernel(x_ref, w_ref, b_ref, o_ref):
    # x_ref block: (nb, C, HWp) in the input dtype (no full-block f32 copy).
    x = x_ref[...]

    # Channel pools. Max is exact in the native dtype; the sum accumulates in
    # f32 on the reduce only (1/C is folded into the AvgPool half of w_ref).
    mp = jnp.max(x, axis=1)                                  # (nb, HWp)
    sp = jnp.sum(x, axis=1, dtype=jnp.float32)               # (nb, HWp)

    # One fused bf16 MXU matmul (f32 accumulation) replaces the 7x7 conv.
    pooled = jnp.concatenate(
        [mp.astype(jnp.bfloat16), sp.astype(jnp.bfloat16)], axis=-1)   # (nb, 2*HWp)
    conv = jnp.dot(pooled, w_ref[...],
                   preferred_element_type=jnp.float32) + b_ref[0]      # (nb, HWp)

    # gate = 1 + sigmoid(conv), computed once on the small pooled map.
    gate = 1.0 + 1.0 / (1.0 + jnp.exp(-conv))

    # out = Ms * x + x = gate * x, multiplied in the input dtype (broadcast over C).
    o_ref[...] = (x * gate.astype(x.dtype)[:, None, :]).astype(o_ref.dtype)


def _choose_block_batch(N, C, HW_pad, itemsize, num_cores, vmem_cap, const_bytes):
    per_sample = C * HW_pad * itemsize
    # Per-sample VMEM cost: in + out double-buffered (4x) + broadcast temp (1x)
    # + small pooled/conv/gate maps (~32 B per spatial position).
    per_sample_cost = 5 * per_sample + 32 * HW_pad
    budget = vmem_cap - 2 * const_bytes - (4 << 20)
    cap = max(1, budget // per_sample_cost)
    # HBM-bound: ~8-16 MiB of x per block amortizes the ~0.35 us/step overhead.
    cap = min(cap, max(1, (12 << 20) // per_sample))
    if num_cores >= 2 and N >= 2:
        cap = min(cap, (N + 1) // 2)       # keep >= 2 grid steps for 2 TensorCores
    nb = min(N, cap)
    if nb >= 8:
        nb = (nb // 8) * 8                 # sublane-friendly matmul LHS rows
    return max(1, int(nb))


def spatial_attention(x, weight, bias):
    """x: (N, C, H, W); weight: (1, 2, 7, 7); bias: (1,)."""
    N, C, H, W = x.shape
    HW = H * W
    HW_pad = ((HW + 127) // 128) * 128                       # lane-dense stores
    x_flat = x.reshape(N, C, HW)
    if HW_pad != HW:
        x_flat = jnp.pad(x_flat, ((0, 0), (0, 0), (0, HW_pad - HW)))

    w_stk = _folded_conv_operator(weight, H, W, C, HW_pad)   # (2*HWp, HWp) bf16
    b = bias.astype(jnp.float32)

    num_cores, vmem_cap = _device_budget()
    itemsize = jnp.dtype(x.dtype).itemsize
    const_bytes = (2 * HW_pad) * HW_pad * 2                  # bf16 stacked operator
    nb = _choose_block_batch(N, C, HW_pad, itemsize, num_cores, vmem_cap, const_bytes)
    grid = (pl.cdiv(N, nb),)

    block_bytes = nb * C * HW_pad * itemsize
    need = 5 * block_bytes + 2 * const_bytes + nb * HW_pad * 32 + (2 << 20)
    vmem_limit = int(min(vmem_cap, max(need, 32 << 20)))

    out_flat = pl.pallas_call(
        spatial_attention_kernel,
        out_shape=jax.ShapeDtypeStruct((N, C, HW_pad), x.dtype),
        grid=grid,
        in_specs=[
            pl.BlockSpec((nb, C, HW_pad), lambda n: (n, 0, 0)),
            pl.BlockSpec((2 * HW_pad, HW_pad), lambda n: (0, 0)),  # constant, resident
            pl.BlockSpec(memory_space=pltpu.MemorySpace.SMEM),     # bias scalar
        ],
        out_specs=pl.BlockSpec((nb, C, HW_pad), lambda n: (n, 0, 0)),
        compiler_params=pltpu.CompilerParams(
            dimension_semantics=("parallel",),
            vmem_limit_bytes=vmem_limit,
        ),
    )(x_flat, w_stk, b)

    out = out_flat[..., :HW] if HW_pad != HW else out_flat
    return out.reshape(N, C, H, W)


def reference_spatial_attention(x, weight, bias):
    """Pure-JAX reference mirroring the PyTorch forward."""
    mp = jnp.max(x, axis=1, keepdims=True)
    ap = jnp.mean(x, axis=1, keepdims=True)
    xc = jnp.concatenate([mp, ap], axis=1)
    conv = jax.lax.conv_general_dilated(
        xc, weight, window_strides=(1, 1), padding=((PAD, PAD), (PAD, PAD)),
        dimension_numbers=("NCHW", "OIHW", "NCHW"))
    conv = conv + bias.reshape(1, -1, 1, 1)
    ms = jax.nn.sigmoid(conv)
    return ms * x + x


if __name__ == "__main__":
    key = jax.random.PRNGKey(0)
    kx, kw, kb = jax.random.split(key, 3)

    N, C, H, W = 2, 4, 16, 16
    x = jax.random.normal(kx, (N, C, H, W), dtype=jnp.float32)
    # Deterministic synthetic Conv2d(2, 1, 7, padding=3) parameters.
    weight = jax.random.normal(kw, (1, 2, KSIZE, KSIZE), dtype=jnp.float32) * 0.1
    bias = jax.random.normal(kb, (1,), dtype=jnp.float32) * 0.1

    out = spatial_attention(x, weight, bias)
    jax.block_until_ready(out)

    ref = reference_spatial_attention(x, weight, bias)
    assert out.shape == x.shape and out.dtype == x.dtype
    if not jnp.allclose(out, ref, atol=1e-2, rtol=1e-2):
        max_err = jnp.max(jnp.abs(out - ref))
        raise AssertionError(f"Pallas kernel mismatch vs reference, max |err| = {max_err}")

    print("KERNEL_OK")
</pallas_src>

<mosaic_0001>
module attributes {stable_mosaic.version = 11 : i64} {
  func.func @spatial_attention_kernel(%arg0: i32, %arg1: memref<2x4x256xf32, #tpu.memory_space<vmem>>, %arg2: memref<512x256xbf16, #tpu.memory_space<vmem>>, %arg3: memref<1xf32, #tpu.memory_space<smem>>, %arg4: memref<2x4x256xf32, #tpu.memory_space<vmem>>) attributes {dimension_semantics = [#tpu.dimension_semantics<parallel>], iteration_bounds = array<i64: 1>, scalar_prefetch = 0 : i64, scratch_operands = 0 : i64, tpu.core_type = #tpu.core_type<tc>, window_params = [{transform_indices = @transform_0, window_bounds = array<i64: 2, 4, 256>}, {pipeline_mode = #tpu.pipeline_mode<synchronous>, transform_indices = @transform_1, window_bounds = array<i64: 512, 256>}, {transform_indices = @transform_2, window_bounds = array<i64: 1>}, {transform_indices = @transform_3, window_bounds = array<i64: 2, 4, 256>}]} {
    %c0 = arith.constant 0 : index
    %c0_0 = arith.constant 0 : index
    %c0_1 = arith.constant 0 : index
    %0 = vector.load %arg1[%c0, %c0_0, %c0_1] : memref<2x4x256xf32, #tpu.memory_space<vmem>>, vector<2x4x256xf32>
    %cst = arith.constant dense<0xFF800000> : vector<2x256xf32>
    %1 = vector.multi_reduction <maximumf>, %0, %cst [1] : vector<2x4x256xf32> to vector<2x256xf32>
    %cst_2 = arith.constant dense<0.000000e+00> : vector<2x256xf32>
    %2 = vector.multi_reduction <add>, %0, %cst_2 [1] : vector<2x4x256xf32> to vector<2x256xf32>
    %3 = arith.truncf %1 : vector<2x256xf32> to vector<2x256xbf16>
    %4 = arith.truncf %2 : vector<2x256xf32> to vector<2x256xbf16>
    %5 = tpu.concatenate %3, %4 in 1 : vector<2x256xbf16>, vector<2x256xbf16> -> vector<2x512xbf16>
    %c0_3 = arith.constant 0 : index
    %c0_4 = arith.constant 0 : index
    %6 = vector.load %arg2[%c0_3, %c0_4] : memref<512x256xbf16, #tpu.memory_space<vmem>>, vector<512x256xbf16>
    %cst_5 = arith.constant dense<0.000000e+00> : vector<2x256xf32>
    %7 = tpu.matmul %5, %6, %cst_5 {dimension_numbers = #tpu.dot_dimension_numbers<[1], [0], [0], [1], [0, 0, 1, 1], [], []>} : vector<2x512xbf16>, vector<512x256xbf16>, vector<2x256xf32> -> vector<2x256xf32>
    %c0_6 = arith.constant 0 : index
    %8 = memref.load %arg3[%c0_6] : memref<1xf32, #tpu.memory_space<smem>>
    %9 = vector.broadcast %8 : f32 to vector<2x256xf32>
    %10 = arith.addf %7, %9 : vector<2x256xf32>
    %cst_7 = arith.constant 0.000000e+00 : f32
    %11 = vector.broadcast %cst_7 : f32 to vector<2x256xf32>
    %12 = arith.subf %11, %10 : vector<2x256xf32>
    %13 = math.exp %12 : vector<2x256xf32>
    %cst_8 = arith.constant 1.000000e+00 : f32
    %14 = vector.broadcast %cst_8 : f32 to vector<2x256xf32>
    %15 = arith.addf %14, %13 : vector<2x256xf32>
    %cst_9 = arith.constant 1.000000e+00 : f32
    %16 = vector.broadcast %cst_9 : f32 to vector<2x256xf32>
    %17 = arith.divf %16, %15 : vector<2x256xf32>
    %cst_10 = arith.constant 1.000000e+00 : f32
    %18 = vector.broadcast %cst_10 : f32 to vector<2x256xf32>
    %19 = arith.addf %18, %17 : vector<2x256xf32>
    %20 = vector.shape_cast %19 : vector<2x256xf32> to vector<2x1x256xf32>
    %21 = vector.broadcast %20 : vector<2x1x256xf32> to vector<2x4x256xf32>
    %22 = arith.mulf %0, %21 : vector<2x4x256xf32>
    %c0_11 = arith.constant 0 : index
    %c0_12 = arith.constant 0 : index
    %c0_13 = arith.constant 0 : index
    %23 = vector.load %arg4[%c0_11, %c0_12, %c0_13] : memref<2x4x256xf32, #tpu.memory_space<vmem>>, vector<2x4x256xf32>
    tpu.vector_store %arg4[%c0_11, %c0_12, %c0_13], %22 {strides = array<i32>} : memref<2x4x256xf32, #tpu.memory_space<vmem>>, vector<2x4x256xf32>,
    return
  }
  func.func @transform_0(%arg0: i32) -> (i32, i32, i32) {
    %c0_i32 = arith.constant 0 : i32
    %c0_i32_0 = arith.constant 0 : i32
    %c0_i32_1 = arith.constant 0 : i32
    return %arg0, %c0_i32, %c0_i32_0 : i32, i32, i32
  }
  func.func @transform_1(%arg0: i32) -> (i32, i32) {
    %c0_i32 = arith.constant 0 : i32
    %c0_i32_0 = arith.constant 0 : i32
    %c0_i32_1 = arith.constant 0 : i32
    return %c0_i32, %c0_i32_0 : i32, i32
  }
  func.func @transform_2(%arg0: i32) -> i32 {
    %c0_i32 = arith.constant 0 : i32
    %c0_i32_0 = arith.constant 0 : i32
    return %c0_i32 : i32
  }
  func.func @transform_3(%arg0: i32) -> (i32, i32, i32) {
    %c0_i32 = arith.constant 0 : i32
    %c0_i32_0 = arith.constant 0 : i32
    %c0_i32_1 = arith.constant 0 : i32
    return %arg0, %c0_i32, %c0_i32_0 : i32, i32, i32
  }
}

</mosaic_0001>

<bundles_post_ra>
// kernel: tpu_custom_call.1
= control target key start
LH: loop header
LB: loop body
LE: loop exit
PB: predicated region body
PF: predicated region fallthrough
CT: control target
= control target key end

     0   :  { %9 = vsyncpa [#allocation4], 0  ;;  %s1010_s0 = inlined_call_operand.hbm [shape: f32[2,4,256], index: 0, kind: input, shape index: {}]   ;;  %s1011_s1 = inlined_call_operand.hbm [shape: bf16[512,256], index: 1, kind: input, shape index: {}]   ;;  %s1012_s2 = inlined_call_operand.<no memory space> [shape: f32[1], index: 2, kind: input, shape index: {}]   ;;  %s1013_s3 = inlined_call_operand.hbm [shape: f32[2,4,256], index: 3, kind: output, shape index: {}]  }
   0x1   :  { %10 = vsyncpa [#allocation7], 0 }
   0x2   :  { %11 = vsyncpa [#allocation5], 0  ;;  %s937_s12 = smov [#allocation3]  }
   0x3   :  { %s17_s13 = sshll.u32 %s937_s12, 4  ;;  %s18_s13 = int_to_ptr.vmem [resolvable:$true] %s17_s13 }
   0x4   :  { %s879_s14 = scalar_lea.vmem %s18_s13, 256  ;;  %p884_p1 = scmp.lt.s32.totalorder %s18_s13, %s18_s13 }
   0x5   :  { %p880_p0 = scmp.ne.s32.totalorder %s18_s13, %s879_s14  ;;  %p885_p2 = scmp.lt.s32.totalorder %s879_s14, %s879_s14 }
   0x7   :  { %p886_p3 = por %p885_p2, %p884_p1 }
   0x9   :  { %p887_p4 = pnand %p886_p3, %p880_p0 }
   0xb   :  { %890 = shalt.err (!%p887_p4)
}
   0xc   :  { %s938_s15 = smov 128   ;;  %s939_s16 = smov 8  }
   0xd   :  { %23 = dma.hbm_to_vmem [thread:$0]  %s1010_s0, 256, %s18_s13, [#allocation4], %s938_s15, %s938_s15, %s939_s16  }
   0xe   :  { %s940_s19 = smov [#allocation6]  }
   0xf   :  { %s29_s20 = sshll.u32 %s940_s19, 4  ;;  %s30_s20 = int_to_ptr.vmem [resolvable:$true] %s29_s20 }
  0x10   :  { %s899_s21 = scalar_lea.vmem %s30_s20, 8192  ;;  %p904_p6 = scmp.lt.s32.totalorder %s30_s20, %s30_s20 }
  0x11   :  { %p900_p5 = scmp.ne.s32.totalorder %s30_s20, %s899_s21  ;;  %p905_p7 = scmp.lt.s32.totalorder %s899_s21, %s899_s21 }
  0x13   :  { %p906_p8 = por %p905_p7, %p904_p6 }
  0x15   :  { %p907_p9 = pnand %p906_p8, %p900_p5 }
  0x17   :  { %910 = shalt.err (!%p907_p9)
}
  0x18   :  { %35 = dma.hbm_to_vmem [thread:$0]  %s1011_s1, 8192, %s30_s20, [#allocation7], %s938_s15, %s938_s15, %s939_s16  }
  0x19   :  { %931 = dma.done.wait [#allocation4], 256  }
  0x1a   :  { %932 = vsyncadd [#allocation4], 4294967040 }
  0x1b   :  { %933 = dma.done.wait [#allocation7], 8192  }
  0x1c   :  { %934 = vsyncadd [#allocation7], 4294959104  ;;  %v765_v0 = vld [vmem:[#allocation6 + $0x74] ss:$8 sps:$4 sm:$0xff]   ;;  %v769_v2 = vld [vmem:[#allocation6 + $0x70] ss:$8 sps:$4 sm:$0xff]  }
  0x1d   :  { %v767_v1 = vld [vmem:[#allocation6 + $0x174] ss:$8 sps:$4 sm:$0xff]   ;;  %532 = vmatprep.subr.bf16.mxu0 %v765_v0  ;;  %v770_v3 = vld [vmem:[#allocation6 + $0x170] ss:$8 sps:$4 sm:$0xff]   ;;  %v771_v4 = vld [vmem:[#allocation6 + $0x64] ss:$8 sps:$4 sm:$0xff]  }
  0x1e   :  { %573 = vmatprep.subr.bf16.mxu1 %v767_v1  ;;  %533 = vmatpush1.bf16.msra.mxu0 %v769_v2  ;;  %v773_v5 = vld [vmem:[#allocation6 + $0x164] ss:$8 sps:$4 sm:$0xff]   ;;  %v775_v6 = vld [vmem:[#allocation6 + $0x60] ss:$8 sps:$4 sm:$0xff]   ;;  %v777_v8 = vld [vmem:[#allocation6 + $0x54] ss:$8 sps:$4 sm:$0xff]  }
  0x1f   :  { %574 = vmatpush1.bf16.msra.mxu1 %v770_v3  ;;  %534 = vmatprep.subr.bf16.mxu0 %v771_v4  ;;  %v776_v7 = vld [vmem:[#allocation6 + $0x160] ss:$8 sps:$4 sm:$0xff]   ;;  %v779_v9 = vld [vmem:[#allocation6 + $0x154] ss:$8 sps:$4 sm:$0xff]   ;;  %v781_v10 = vld [vmem:[#allocation6 + $0x50] ss:$8 sps:$4 sm:$0xff]  }
  0x20   :  { %575 = vmatprep.subr.bf16.mxu1 %v773_v5  ;;  %v782_v11 = vld [vmem:[#allocation6 + $0x150] ss:$8 sps:$4 sm:$0xff]   ;;  %v783_v12 = vld [vmem:[#allocation6 + $0x44] ss:$8 sps:$4 sm:$0xff]   ;;  %v787_v14 = vld [vmem:[#allocation6 + $0x40] ss:$8 sps:$4 sm:$0xff]  }
  0x21   :  { %v785_v13 = vld [vmem:[#allocation6 + $0x144] ss:$8 sps:$4 sm:$0xff]   ;;  %v788_v15 = vld [vmem:[#allocation6 + $0x140] ss:$8 sps:$4 sm:$0xff]   ;;  %v789_v16 = vld [vmem:[#allocation6 + $0x34] ss:$8 sps:$4 sm:$0xff]  }
  0x22   :  { %535 = vmatpush1.bf16.msra.mxu0 %v775_v6  ;;  %v791_v17 = vld [vmem:[#allocation6 + $0x134] ss:$8 sps:$4 sm:$0xff]   ;;  %v793_v18 = vld [vmem:[#allocation6 + $0x30] ss:$8 sps:$4 sm:$0xff]   ;;  %v795_v20 = vld [vmem:[#allocation6 + $0x24] ss:$8 sps:$4 sm:$0xff]  }
  0x23   :  { %576 = vmatpush1.bf16.msra.mxu1 %v776_v7  ;;  %536 = vmatprep.subr.bf16.mxu0 %v777_v8  ;;  %v794_v19 = vld [vmem:[#allocation6 + $0x130] ss:$8 sps:$4 sm:$0xff]   ;;  %v797_v21 = vld [vmem:[#allocation6 + $0x124] ss:$8 sps:$4 sm:$0xff]   ;;  %v799_v22 = vld [vmem:[#allocation6 + $0x20] ss:$8 sps:$4 sm:$0xff]  }
  0x24   :  { %577 = vmatprep.subr.bf16.mxu1 %v779_v9  ;;  %v800_v23 = vld [vmem:[#allocation6 + $0x120] ss:$8 sps:$4 sm:$0xff]   ;;  %v801_v24 = vld [vmem:[#allocation6 + $0x14] ss:$8 sps:$4 sm:$0xff]   ;;  %v805_v26 = vld [vmem:[#allocation6 + $0x10] ss:$8 sps:$4 sm:$0xff]  }
  0x25   :  { %v803_v25 = vld [vmem:[#allocation6 + $0x114] ss:$8 sps:$4 sm:$0xff]   ;;  %v806_v27 = vld [vmem:[#allocation6 + $0x110] ss:$8 sps:$4 sm:$0xff]   ;;  %v807_v28 = vld [vmem:[#allocation6 + $0x4] ss:$8 sps:$4 sm:$0xff]  }
  0x26   :  { %537 = vmatpush1.bf16.msra.mxu0 %v781_v10  ;;  %v809_v29 = vld [vmem:[#allocation6 + $0x104] ss:$8 sps:$4 sm:$0xff]   ;;  %v811_v30 = vld [vmem:[#allocation6] ss:$8 sps:$4 sm:$0xff]   ;;  %v813_v32 = vld [vmem:[#allocation6 + $0xf4] ss:$8 sps:$4 sm:$0xff]  }
  0x27   :  { %578 = vmatpush1.bf16.msra.mxu1 %v782_v11  ;;  %538 = vmatprep.subr.bf16.mxu0 %v783_v12  ;;  %v812_v31 = vld [vmem:[#allocation6 + $0x100] ss:$8 sps:$4 sm:$0xff]   ;;  %v815_v33 = vld [vmem:[#allocation6 + $0x1f4] ss:$8 sps:$4 sm:$0xff]   ;;  %v817_v34 = vld [vmem:[#allocation6 + $0xf0] ss:$8 sps:$4 sm:$0xff]  }
  0x28   :  { %579 = vmatprep.subr.bf16.mxu1 %v785_v13  ;;  %v818_v35 = vld [vmem:[#allocation6 + $0x1f0] ss:$8 sps:$4 sm:$0xff]   ;;  %v819_v36 = vld [vmem:[#allocation6 + $0xe4] ss:$8 sps:$4 sm:$0xff]   ;;  %v823_v38 = vld [vmem:[#allocation6 + $0xe0] ss:$8 sps:$4 sm:$0xff]  }
  0x29   :  { %v821_v37 = vld [vmem:[#allocation6 + $0x1e4] ss:$8 sps:$4 sm:$0xff]   ;;  %v824_v39 = vld [vmem:[#allocation6 + $0x1e0] ss:$8 sps:$4 sm:$0xff]   ;;  %v825_v40 = vld [vmem:[#allocation6 + $0xd4] ss:$8 sps:$4 sm:$0xff]  }
  0x2a   :  { %539 = vmatpush1.bf16.msra.mxu0 %v787_v14  ;;  %v827_v41 = vld [vmem:[#allocation6 + $0x1d4] ss:$8 sps:$4 sm:$0xff]   ;;  %v829_v42 = vld [vmem:[#allocation6 + $0xd0] ss:$8 sps:$4 sm:$0xff]   ;;  %v831_v44 = vld [vmem:[#allocation6 + $0xc4] ss:$8 sps:$4 sm:$0xff]  }
  0x2b   :  { %580 = vmatpush1.bf16.msra.mxu1 %v788_v15  ;;  %540 = vmatprep.subr.bf16.mxu0 %v789_v16  ;;  %v830_v43 = vld [vmem:[#allocation6 + $0x1d0] ss:$8 sps:$4 sm:$0xff]   ;;  %vm52_vm0 = vcmask 1043456   ;;  %v833_v45 = vld [vmem:[#allocation6 + $0x1c4] ss:$8 sps:$4 sm:$0xff]   ;;  %vm125_vm1 = vcmask 1041409  }
  0x2c   :  { %581 = vmatprep.subr.bf16.mxu1 %v791_v17  ;;  %v835_v46 = vld [vmem:[#allocation6 + $0xc0] ss:$8 sps:$4 sm:$0xff]   ;;  %v975_v47 = vld [vmem:[#allocation3] sm:$0xff]  ;;  %v977_v49 = vld [vmem:[#allocation3 + $0x8] sm:$0xff] }
  0x2d   :  { %v836_v48 = vld [vmem:[#allocation6 + $0x1c0] ss:$8 sps:$4 sm:$0xff]   ;;  %v48_v50 = vcombine.high %v975_v47, %v975_v47  ;;  %v53_v51 = vsel %vm52_vm0, %v975_v47, -inf  ;;  %v81_v52 = vsel %vm52_vm0, %v975_v47, 0.0  ;;  %v837_v53 = vld [vmem:[#allocation6 + $0xb4] ss:$8 sps:$4 sm:$0xff]   ;;  %v49_v54 = vcombine.high %v977_v49, %v977_v49 }
  0x2e   :  { %541 = vmatpush1.bf16.msra.mxu0 %v793_v18  ;;  %v54_v55 = vrot.slane %v53_v51, 4  ;;  %v67_v56 = vsel %vm52_vm0, %v977_v49, -inf  ;;  %v82_v57 = vrot.slane %v81_v52, 4  ;;  %v839_v58 = vld [vmem:[#allocation6 + $0x1b4] ss:$8 sps:$4 sm:$0xff]   ;;  %v95_v62 = vsel %vm52_vm0, %v977_v49, 0.0 }
  0x2f   :  { %582 = vmatpush1.bf16.msra.mxu1 %v794_v19  ;;  %542 = vmatprep.subr.bf16.mxu0 %v795_v20  ;;  %v60_v59 = vsel %vm52_vm0, %v48_v50, -inf  ;;  %v88_v60 = vsel %vm52_vm0, %v48_v50, 0.0  ;;  %v68_v61 = vrot.slane %v67_v56, 4  ;;  %v74_v0 = vsel %vm52_vm0, %v49_v54, -inf  ;;  %v841_v7 = vld [vmem:[#allocation6 + $0xb0] ss:$8 sps:$4 sm:$0xff]  }
  0x30   :  { %583 = vmatprep.subr.bf16.mxu1 %v797_v21  ;;  %v61_v63 = vrot.slane %v60_v59, 4  ;;  %v89_v1 = vrot.slane %v88_v60, 4  ;;  %v102_v2 = vsel %vm52_vm0, %v49_v54, 0.0  ;;  %v75_v3 = vrot.slane %v74_v0, 4  ;;  %v842_v8 = vld [vmem:[#allocation6 + $0x1b0] ss:$8 sps:$4 sm:$0xff]  }
  0x31   :  { %v103_v4 = vrot.slane %v102_v2, 4  ;;  %v55_v5 = vmax.f32 %v53_v51, %v54_v55  ;;  %v69_v6 = vmax.f32 %v67_v56, %v68_v61  ;;  %v83_v11 = vadd.f32 %v82_v57, %v81_v52  ;;  %v843_v13 = vld [vmem:[#allocation6 + $0xa4] ss:$8 sps:$4 sm:$0xff]   ;;  %v854_v50 = vld [vmem:[#allocation6 + $0x190] ss:$8 sps:$4 sm:$0xff]  }
  0x32   :  { %543 = vmatpush1.bf16.msra.mxu0 %v799_v22  ;;  %v62_v9 = vmax.f32 %v60_v59, %v61_v63  ;;  %v90_v10 = vadd.f32 %v89_v1, %v88_v60  ;;  %v96_v12 = vrot.slane %v95_v62, 4  ;;  %v845_v14 = vld [vmem:[#allocation6 + $0x1a4] ss:$8 sps:$4 sm:$0xff]   ;;  %v76_v15 = vmax.f32 %v74_v0, %v75_v3 }
  0x33   :  { %584 = vmatpush1.bf16.msra.mxu1 %v800_v23  ;;  %544 = vmatprep.subr.bf16.mxu0 %v801_v24  ;;  %v104_v16 = vadd.f32 %v103_v4, %v102_v2  ;;  %v56_v17 = vrot.slane %v55_v5, 2  ;;  %v70_v18 = vrot.slane %v69_v6, 2  ;;  %v84_v21 = vrot.slane %v83_v11, 2  ;;  %v855_v55 = vld [vmem:[#allocation6 + $0x84] ss:$8 sps:$4 sm:$0xff]  }
  0x34   :  { %585 = vmatprep.subr.bf16.mxu1 %v803_v25  ;;  %v63_v19 = vrot.slane %v62_v9, 2  ;;  %v91_v20 = vrot.slane %v90_v10, 2  ;;  %v97_v22 = vadd.f32 %v96_v12, %v95_v62  ;;  %v77_v23 = vrot.slane %v76_v15, 2  ;;  %v857_v56 = vld [vmem:[#allocation6 + $0x184] ss:$8 sps:$4 sm:$0xff]  }
  0x35   :  { %v105_v24 = vrot.slane %v104_v16, 2  ;;  %v57_v25 = vmax.f32 %v55_v5, %v56_v17  ;;  %v859_v4 = vld [vmem:[#allocation6 + $0x80] ss:$8 sps:$4 sm:$0xff]  }
  0x36   :  { %545 = vmatpush1.bf16.msra.mxu0 %v805_v26  ;;  %v71_v26 = vmax.f32 %v69_v6, %v70_v18  ;;  %v860_v5 = vld [vmem:[#allocation6 + $0x180] ss:$8 sps:$4 sm:$0xff]  }
  0x37   :  { %586 = vmatpush1.bf16.msra.mxu1 %v806_v27  ;;  %546 = vmatprep.subr.bf16.mxu0 %v807_v28  ;;  %v847_v27 = vld [vmem:[#allocation6 + $0xa0] ss:$8 sps:$4 sm:$0xff]  }
  0x38   :  { %587 = vmatprep.subr.bf16.mxu1 %v809_v29  ;;  %v848_v28 = vld [vmem:[#allocation6 + $0x1a0] ss:$8 sps:$4 sm:$0xff]   ;;  %v64_v29 = vmax.f32 %v62_v9, %v63_v19 }
  0x3a   :  { %547 = vmatpush1.bf16.msra.mxu0 %v811_v30  ;;  %v92_v30 = vadd.f32 %v91_v20, %v90_v10 }
  0x3b   :  { %588 = vmatpush1.bf16.msra.mxu1 %v812_v31  ;;  %548 = vmatprep.subr.bf16.mxu0 %v813_v32  ;;  %v85_v31 = vadd.f32 %v84_v21, %v83_v11  ;;  %v98_v32 = vrot.slane %v97_v22, 2 }
  0x3c   :  { %589 = vmatprep.subr.bf16.mxu1 %v815_v33  ;;  %v849_v33 = vld [vmem:[#allocation6 + $0x94] ss:$8 sps:$4 sm:$0xff]  }
  0x3e   :  { %549 = vmatpush2.bf16.msra.mxu0 %v817_v34  ;;  %v851_v34 = vld [vmem:[#allocation6 + $0x194] ss:$8 sps:$4 sm:$0xff]  }
  0x3f   :  { %590 = vmatpush2.bf16.msra.mxu1 %v818_v35  ;;  %550 = vmatprep.subr.bf16.mxu0 %v819_v36  ;;  %v78_v35 = vmax.f32 %v76_v15, %v77_v23  ;;  %v106_v36 = vadd.f32 %v105_v24, %v104_v16 }
  0x40   :  { %591 = vmatprep.subr.bf16.mxu1 %v821_v37  ;;  %v58_v37 = vrot.slane %v57_v25, 1 }
  0x42   :  { %551 = vmatpush2.bf16.msra.mxu0 %v823_v38  ;;  %v72_v38 = vrot.slane %v71_v26, 1 }
  0x43   :  { %592 = vmatpush2.bf16.msra.mxu1 %v824_v39  ;;  %552 = vmatprep.subr.bf16.mxu0 %v825_v40  ;;  %v65_v39 = vrot.slane %v64_v29, 1  ;;  %v93_v40 = vrot.slane %v92_v30, 1 }
  0x44   :  { %593 = vmatprep.subr.bf16.mxu1 %v827_v41  ;;  %v86_v41 = vrot.slane %v85_v31, 1 }
  0x45   :  { %v66_v51 = vmax.f32 %v64_v29, %v65_v39  ;;  %v94_v52 = vadd.f32 %v93_v40, %v92_v30 }
  0x46   :  { %553 = vmatpush2.bf16.msra.mxu0 %v829_v42  ;;  %v99_v42 = vadd.f32 %v98_v32, %v97_v22  ;;  %v211_v22 = vstv %s1012_s2  ;;  %s942_s2 = smov [#allocation8]  }
  0x47   :  { %594 = vmatpush2.bf16.msra.mxu1 %v830_v43  ;;  %554 = vmatprep.subr.bf16.mxu0 %v831_v44  ;;  %v79_v43 = vrot.slane %v78_v35, 1  ;;  %v107_v44 = vrot.slane %v106_v36, 1  ;;  %v110_v60 = vpack.c.bf16 %v66_v51, %v66_v51  ;;  %v114_v61 = vpack.c.bf16 %v94_v52, %v94_v52  ;;  %s682_s24 = sshll.u32 %s942_s2, 4  ;;  %s683_s24 = int_to_ptr.vmem [resolvable:$true] %s682_s24 }
  0x48   :  { %595 = vmatprep.subr.bf16.mxu1 %v833_v45  ;;  %v59_v45 = vmax.f32 %v57_v25, %v58_v37  ;;  %v100_v54 = vrot.slane %v99_v42, 1  ;;  %s911_s25 = scalar_lea.vmem %s683_s24, 256  ;;  %p916_p11 = scmp.lt.s32.totalorder %s683_s24, %s683_s24 }
  0x49   :  { %v80_v57 = vmax.f32 %v78_v35, %v79_v43  ;;  %v122_v6 = vunpack.c.l.b16 %v110_v60  ;;  %v941_v43 = vmov 1966171168   ;;  %p912_p10 = scmp.ne.s32.totalorder %s683_s24, %s911_s25  ;;  %p917_p12 = scmp.lt.s32.totalorder %s911_s25, %s911_s25 }
  0x4a   :  { %555 = vmatpush2.bf16.msra.mxu0 %v835_v46  ;;  %v73_v46 = vmax.f32 %v71_v26, %v72_v38  ;;  %v109_v59 = vpack.c.bf16 %v59_v45, %v59_v45  ;;  %v101_v63 = vadd.f32 %v100_v54, %v99_v42  ;;  %v634_v45 = vlaneseq }
  0x4b   :  { %596 = vmatpush2.bf16.msra.mxu1 %v836_v48  ;;  %556 = vmatprep.subr.bf16.mxu0 %v837_v53  ;;  %v853_v48 = vld [vmem:[#allocation6 + $0x90] ss:$8 sps:$4 sm:$0xff]   ;;  %v87_v53 = vadd.f32 %v86_v41, %v85_v31  ;;  %v112_v0 = vpack.c.bf16 %v80_v57, %v80_v57  ;;  %p918_p13 = por %p917_p12, %p916_p11 }
  0x4c   :  { %597 = vmatprep.subr.bf16.mxu1 %v839_v58  ;;  %v108_v58 = vadd.f32 %v107_v44, %v106_v36  ;;  %v111_v62 = vpack.c.bf16 %v73_v46, %v73_v46  ;;  %v121_v2 = vunpack.c.l.b16 %v109_v59  ;;  %v115_v9 = vpack.c.bf16 %v101_v63, %v101_v63 }
  0x4d   :  { %v113_v3 = vpack.c.bf16 %v87_v53, %v87_v53  ;;  %v124_v10 = vunpack.c.l.b16 %v112_v0  ;;  %v632_v44 = vunpack.c.l.s4 %v941_v43  ;;  %p919_p0 = pnand %p918_p13, %p912_p10 }
  0x4e   :  { %557 = vmatpush2.bf16.msra.mxu0 %v841_v7  ;;  %v116_v1 = vpack.c.bf16 %v108_v58, %v108_v58  ;;  %v137_v7 = vunpack.c.l.b16 %v114_v61 }
  0x4f   :  { %598 = vmatpush2.bf16.msra.mxu1 %v842_v8  ;;  %558 = vmatprep.subr.bf16.mxu0 %v843_v13  ;;  %v123_v8 = vunpack.c.l.b16 %v111_v62  ;;  %v136_v12 = vunpack.c.l.b16 %v113_v3  ;;  %v127_v15 = vsel %vm125_vm1, %v124_v10, %v122_v6  ;;  %v633_v46 = vunpack.c.0.s8 %v632_v44 }
  0x50   :  { %599 = vmatprep.subr.bf16.mxu1 %v845_v14  ;;  %v139_v11 = vunpack.c.l.b16 %v116_v1  ;;  %v138_v14 = vunpack.c.l.b16 %v115_v9  ;;  %v129_v18 = vpack.c.b16 %v127_v15, %v127_v15 }
  0x51   :  { %v126_v13 = vsel %vm125_vm1, %v123_v8, %v121_v2 }
  0x52   :  { %559 = vmatpush2.bf16.msra.mxu0 %v847_v27  ;;  %v141_v16 = vsel %vm125_vm1, %v139_v11, %v137_v7  ;;  %v128_v17 = vpack.c.b16 %v126_v13, %v126_v13  ;;  %v140_v20 = vsel %vm125_vm1, %v138_v14, %v136_v12  ;;  %564 = vmatprep.mubr.bf16.mxu0 %v129_v18 }
  0x53   :  { %600 = vmatpush2.bf16.msra.mxu1 %v848_v28  ;;  %560 = vmatprep.subr.bf16.mxu0 %v849_v33  ;;  %v143_v19 = vpack.c.b16 %v141_v16, %v141_v16  ;;  %v142_v21 = vpack.c.b16 %v140_v20, %v140_v20 }
  0x54   :  { %601 = vmatprep.subr.bf16.mxu1 %v851_v34 }
  0x55   :  { %605 = vmatprep.mubr.bf16.mxu1 %v143_v19 }
  0x56   :  { %561 = vmatpush2.bf16.msra.mxu0 %v853_v48  ;;  %v635_v48 = vshrl.u32 %v634_v45, 7 }
  0x57   :  { %602 = vmatpush2.bf16.msra.mxu1 %v854_v50  ;;  %562 = vmatprep.subr.bf16.mxu0 %v855_v55 }
  0x58   :  { %603 = vmatprep.subr.bf16.mxu1 %v857_v56  ;;  %v636_v54 = vsub.s32 %v633_v46, %v635_v48  ;;  %v655_v57 = vsub.s32 0, %v635_v48  ;;  %v659_v58 = vsub.s32 1, %v635_v48 }
  0x5a   :  { %563 = vmatpush2.bf16.msra.mxu0 %v859_v4 }
  0x5b   :  { %604 = vmatpush2.bf16.msra.mxu1 %v860_v5 }
  0x5d   :  { %565 = vmatmul.mubr.bf16.vlgmr.msra.gmra.mxu0 %v128_v17 }
  0x5e   :  { %606 = vmatmul.mubr.bf16.vlgmr.msra.gmra.mxu1 %v142_v21 }
 0x11d   :  { %v566_v23 = vpop.f32.mrf.mxu0 }
 0x11e   :  { %v607_v24 = vpop.f32.mrf.mxu1  ;;  %v567_v25 = vadd.f32 %v566_v23, %v211_v22 }
 0x11f   :  { %v568_v26 = vpop.f32.mrf.mxu0 }
 0x120   :  { %v609_v27 = vpop.f32.mrf.mxu1  ;;  %v608_v28 = vadd.f32 %v607_v24, %v567_v25  ;;  %v569_v29 = vadd.f32 %v568_v26, %v211_v22 }
 0x121   :  { %v570_v30 = vpop.f32.mrf.mxu0 }
 0x122   :  { %v611_v31 = vpop.f32.mrf.mxu1  ;;  %v614_v32 = vsub.f32 0.0, %v608_v28  ;;  %v610_v33 = vadd.f32 %v609_v27, %v569_v29 }
 0x123   :  { %v571_v34 = vpop.f32.mrf.mxu0 }
 0x124   :  { %v612_v35 = vpop.f32.mrf.mxu1  ;;  %v616_v36 = vmul.f32 1.442695, %v614_v32  ;;  %v615_v37 = vsub.f32 0.0, %v610_v33 }
 0x126   :  { %863 = vpow2.f32 %v616_v36  ;;  %v618_v38 = vmul.f32 1.442695, %v615_v37 }
 0x128   :  { %865 = vpow2.f32 %v618_v38 }
 0x133   :  { %v864_v39 = vpop.eup %863 }
 0x134   :  { %v620_v40 = vadd.f32 1.0, %v864_v39 }
 0x135   :  { %v866_v41 = vpop.eup %865 }
 0x136   :  { %867 = vrcp.f32 %v620_v40  ;;  %v621_v42 = vadd.f32 1.0, %v866_v41 }
 0x138   :  { %869 = vrcp.f32 %v621_v42 }
 0x143   :  { %v868_v50 = vpop.eup %867 }
 0x144   :  { %v626_v52 = vadd.f32 1.0, %v868_v50 }
 0x145   :  { %v870_v51 = vpop.eup %869 }
 0x146   :  { %v627_v53 = vadd.f32 1.0, %v870_v51 }
 0x148   :  { %v630_v55 = vcombine.low %v626_v52, %v627_v53 }
 0x14a   :  { %v637_v56 = vrot.slane %v630_v55, %v636_v54 }
 0x14c   :  { %v638_v59 = vcombine.high %v637_v56, %v637_v56  ;;  %v645_v60 = vrot.slane %v637_v56, %v636_v54 }
 0x14e   :  { %v652_v61 = vrot.slane %v638_v59, %v636_v54  ;;  %v656_v62 = vrot.slane %v645_v60, %v655_v57  ;;  %v660_v63 = vrot.slane %v645_v60, %v659_v58 }
 0x150   :  { %v664_v0 = vrot.slane %v652_v61, %v655_v57  ;;  %v668_v1 = vrot.slane %v652_v61, %v659_v58  ;;  %v669_v2 = vcombine.low %v656_v62, %v660_v63 }
 0x152   :  { %v670_v3 = vcombine.low %v664_v0, %v668_v1  ;;  %v673_v4 = vmul.f32 %v669_v2, %v975_v47 }
 0x154   :  { %v674_v5 = vmul.f32 %v670_v3, %v977_v49  ;;  %675 = vst [vmem:[#allocation8] sm:$0xff] %v673_v4 }
 0x156   :  { %676 = vst [vmem:[#allocation8 + $0x8] sm:$0xff] %v674_v5 }
 0x157   :  { %922 = shalt.err (!%p919_p0)
}
 0x158   :  { %688 = dma.vmem_to_hbm [thread:$0]  %s683_s24, 256, %s1013_s3, [#allocation5], %s938_s15, %s938_s15, %s939_s16  }
 0x159   :  { %935 = dma.done.wait [#allocation5], 256  }
 0x15a   :  { %936 = vsyncadd [#allocation5], 4294967040 }
 0x15b   :  { %692 = vsyncpa [#allocation4], 1 }
 0x15c   :  { %693 = vsyncpa [#allocation7], 1 }
 0x15d   :  { %694 = vsyncpa [#allocation5], 1 }

</bundles_post_ra>
